<compile_context>
chip_gen: v6e
topology: v6e:2x2x1
jax: 0.10.0
libtpu: 0.0.40
codegen_flags: <defaults>
</compile_context>

<pallas_src>
import functools
import math

import jax
import jax.numpy as jnp
from jax.experimental import pallas as pl
from jax.experimental.pallas import tpu as pltpu


def _round_up(v, m):
    return (v + m - 1) // m * m


def _vmem_capacity_bytes():
    # v5e/v6e: 128 MiB per TensorCore, v7x: 64 MiB. Conservative fallback if
    # the query is unavailable (e.g. interpret mode).
    try:
        return int(pltpu.get_tpu_info().vmem_capacity_bytes)
    except Exception:
        return 64 << 20


def _layernorm_kernel(x_ref, gamma_ref, beta_ref, o_ref, *, hidden, eps):
    # x_ref: (tm, H) row tile; the hidden axis equals the full array dim, so
    # the logical shape here is exact and reductions need no lane masking.
    x = x_ref[...].astype(jnp.float32)

    # Two-pass mean / unbiased variance (torch.std default, ddof=1).
    mean = jnp.sum(x, axis=-1, keepdims=True) * (1.0 / hidden)
    diff = x - mean
    # hidden == 1 -> ddof=1 std is NaN in torch; mirror that instead of 1/0.
    inv_nm1 = (1.0 / (hidden - 1)) if hidden > 1 else float("nan")
    var = jnp.sum(diff * diff, axis=-1, keepdims=True) * inv_nm1
    std = jnp.sqrt(var)

    # eps added to std (not var), matching torch. Exact divide: this is a
    # (tm, 1) column, fully hidden under the HBM DMA in a mem-bound kernel.
    inv = 1.0 / (std + eps)

    o_ref[...] = (gamma_ref[...] * (diff * inv) + beta_ref[...]).astype(o_ref.dtype)


def _choose_tile_rows(rows, H, itemsize):
    """Row-tile size: big enough to amortize the ~0.35us per-grid-step cost,
    small enough to double-buffer in VMEM, and >= 2 grid steps so v7x's two
    TensorCores both get work (harmless on single-TC v5e/v6e)."""
    if rows <= 8:
        return rows  # block dims == full array dims (always legal)

    Hp = _round_up(H, 128)          # internal lane padding of the VMEM tile
    row_bytes = Hp * itemsize

    # Target ~8 MiB per block (mem-bound sweet spot on all generations).
    target_block_bytes = 8 << 20
    tm = max(8, (target_block_bytes // row_bytes) // 8 * 8)

    # VMEM budget: double-buffered input + output tiles must fit w/ headroom.
    capacity = _vmem_capacity_bytes()
    budget = max(16 << 20, capacity - (16 << 20))
    tm_vmem = max(8, (budget // (4 * row_bytes)) // 8 * 8)
    tm = min(tm, tm_vmem)

    # Never bigger than the (8-rounded) row count.
    tm = min(tm, _round_up(rows, 8))

    # Keep at least 2 grid steps for the "parallel" axis (v7x dual-TC).
    tm = min(tm, max(8, _round_up(pl.cdiv(rows, 2), 8)))
    return tm


def layer_norm(x, gamma, beta, *, eps=1e-6):
    """Paper-style LayerNorm over the last axis of x (..., H)."""
    orig_shape = x.shape
    H = orig_shape[-1]
    rows = math.prod(orig_shape[:-1]) if len(orig_shape) > 1 else 1

    x2 = x.reshape(rows, H)              # no padding: no extra HBM round trip
    gamma2 = gamma.reshape(1, H)
    beta2 = beta.reshape(1, H)

    itemsize = jnp.dtype(x.dtype).itemsize
    tm = _choose_tile_rows(rows, H, itemsize)
    grid = (pl.cdiv(rows, tm),)          # partial last tile clipped on write

    Hp = _round_up(H, 128)
    tile_bytes = tm * Hp * itemsize
    vmem_limit = int(min(_vmem_capacity_bytes(),
                         max(32 << 20, 4 * tile_bytes + 2 * Hp * 4 + (4 << 20))))

    kernel = functools.partial(_layernorm_kernel, hidden=H, eps=eps)

    out = pl.pallas_call(
        kernel,
        out_shape=jax.ShapeDtypeStruct((rows, H), x.dtype),
        grid_spec=pltpu.PrefetchScalarGridSpec(
            num_scalar_prefetch=0,
            grid=grid,
            in_specs=[
                pl.BlockSpec((tm, H), lambda i: (i, 0)),   # x row tile
                pl.BlockSpec((1, H), lambda i: (0, 0)),    # gamma (a_2)
                pl.BlockSpec((1, H), lambda i: (0, 0)),    # beta  (b_2)
            ],
            out_specs=pl.BlockSpec((tm, H), lambda i: (i, 0)),
        ),
        compiler_params=pltpu.CompilerParams(
            dimension_semantics=("parallel",),
            vmem_limit_bytes=vmem_limit),
        cost_estimate=pl.CostEstimate(
            flops=8 * rows * H,
            transcendentals=rows,
            bytes_accessed=2 * rows * H * itemsize + 2 * H * itemsize),
    )(x2, gamma2, beta2)

    return out.reshape(orig_shape)


def reference(x, gamma, beta, *, eps=1e-6):
    """Pure-JAX reference mirroring the PyTorch forward."""
    mean = jnp.mean(x, axis=-1, keepdims=True)
    std = jnp.std(x, axis=-1, keepdims=True, ddof=1)   # torch.std default
    return gamma * (x - mean) / (std + eps) + beta


if __name__ == "__main__":
    B, S, H = 2, 8, 32  # hidden = `features` of LayerNorm

    key = jax.random.PRNGKey(0)
    kx, kg, kb = jax.random.split(key, 3)

    x = jax.random.normal(kx, (B, S, H), dtype=jnp.float32)
    # Module init is ones/zeros; perturb slightly to exercise the affine path.
    gamma = jnp.ones((H,), dtype=jnp.float32) + 0.1 * jax.random.normal(
        kg, (H,), dtype=jnp.float32)
    beta = 0.1 * jax.random.normal(kb, (H,), dtype=jnp.float32)

    out = layer_norm(x, gamma, beta)
    out = jax.block_until_ready(out)

    ref = reference(x, gamma, beta)
    assert out.shape == (B, S, H)
    err = float(jnp.max(jnp.abs(out - ref)))
    assert jnp.allclose(out, ref, atol=1e-5, rtol=1e-5), err

    print("KERNEL_OK")
</pallas_src>

<mosaic_0001>
module attributes {stable_mosaic.version = 11 : i64} {
  func.func @_layernorm_kernel(%arg0: i32, %arg1: memref<8x32xf32, #tpu.memory_space<vmem>>, %arg2: memref<1x32xf32, #tpu.memory_space<vmem>>, %arg3: memref<1x32xf32, #tpu.memory_space<vmem>>, %arg4: memref<8x32xf32, #tpu.memory_space<vmem>>) attributes {dimension_semantics = [#tpu.dimension_semantics<parallel>], iteration_bounds = array<i64: 2>, scalar_prefetch = 0 : i64, scratch_operands = 0 : i64, tpu.core_type = #tpu.core_type<tc>, window_params = [{transform_indices = @transform_0, window_bounds = array<i64: 8, 32>}, {pipeline_mode = #tpu.pipeline_mode<synchronous>, transform_indices = @transform_1, window_bounds = array<i64: 1, 32>}, {pipeline_mode = #tpu.pipeline_mode<synchronous>, transform_indices = @transform_2, window_bounds = array<i64: 1, 32>}, {transform_indices = @transform_3, window_bounds = array<i64: 8, 32>}]} {
    %c0 = arith.constant 0 : index
    %c0_0 = arith.constant 0 : index
    %0 = vector.load %arg1[%c0, %c0_0] : memref<8x32xf32, #tpu.memory_space<vmem>>, vector<8x32xf32>
    %cst = arith.constant dense<0.000000e+00> : vector<8xf32>
    %1 = vector.multi_reduction <add>, %0, %cst [1] : vector<8x32xf32> to vector<8xf32>
    %2 = vector.shape_cast %1 : vector<8xf32> to vector<8x1xf32>
    %cst_1 = arith.constant 3.125000e-02 : f32
    %3 = vector.broadcast %cst_1 : f32 to vector<8x1xf32>
    %4 = arith.mulf %2, %3 : vector<8x1xf32>
    %5 = vector.broadcast %4 : vector<8x1xf32> to vector<8x32xf32>
    %6 = arith.subf %0, %5 : vector<8x32xf32>
    %7 = arith.mulf %6, %6 : vector<8x32xf32>
    %cst_2 = arith.constant dense<0.000000e+00> : vector<8xf32>
    %8 = vector.multi_reduction <add>, %7, %cst_2 [1] : vector<8x32xf32> to vector<8xf32>
    %9 = vector.shape_cast %8 : vector<8xf32> to vector<8x1xf32>
    %cst_3 = arith.constant 0.0322580636 : f32
    %10 = vector.broadcast %cst_3 : f32 to vector<8x1xf32>
    %11 = arith.mulf %9, %10 : vector<8x1xf32>
    %12 = math.sqrt %11 : vector<8x1xf32>
    %cst_4 = arith.constant 9.99999997E-7 : f32
    %13 = vector.broadcast %cst_4 : f32 to vector<8x1xf32>
    %14 = arith.addf %12, %13 : vector<8x1xf32>
    %cst_5 = arith.constant 1.000000e+00 : f32
    %15 = vector.broadcast %cst_5 : f32 to vector<8x1xf32>
    %16 = arith.divf %15, %14 : vector<8x1xf32>
    %c0_6 = arith.constant 0 : index
    %c0_7 = arith.constant 0 : index
    %17 = vector.load %arg2[%c0_6, %c0_7] : memref<1x32xf32, #tpu.memory_space<vmem>>, vector<1x32xf32>
    %18 = vector.broadcast %16 : vector<8x1xf32> to vector<8x32xf32>
    %19 = arith.mulf %6, %18 : vector<8x32xf32>
    %20 = vector.broadcast %17 : vector<1x32xf32> to vector<8x32xf32>
    %21 = arith.mulf %20, %19 : vector<8x32xf32>
    %c0_8 = arith.constant 0 : index
    %c0_9 = arith.constant 0 : index
    %22 = vector.load %arg3[%c0_8, %c0_9] : memref<1x32xf32, #tpu.memory_space<vmem>>, vector<1x32xf32>
    %23 = vector.broadcast %22 : vector<1x32xf32> to vector<8x32xf32>
    %24 = arith.addf %21, %23 : vector<8x32xf32>
    %c0_10 = arith.constant 0 : index
    %c0_11 = arith.constant 0 : index
    %25 = vector.load %arg4[%c0_10, %c0_11] : memref<8x32xf32, #tpu.memory_space<vmem>>, vector<8x32xf32>
    tpu.vector_store %arg4[%c0_10, %c0_11], %24 {strides = array<i32>} : memref<8x32xf32, #tpu.memory_space<vmem>>, vector<8x32xf32>,
    return
  }
  func.func @transform_0(%arg0: i32) -> (i32, i32) {
    %c0_i32 = arith.constant 0 : i32
    %c0_i32_0 = arith.constant 0 : i32
    return %arg0, %c0_i32 : i32, i32
  }
  func.func @transform_1(%arg0: i32) -> (i32, i32) {
    %c0_i32 = arith.constant 0 : i32
    %c0_i32_0 = arith.constant 0 : i32
    %c0_i32_1 = arith.constant 0 : i32
    return %c0_i32, %c0_i32_0 : i32, i32
  }
  func.func @transform_2(%arg0: i32) -> (i32, i32) {
    %c0_i32 = arith.constant 0 : i32
    %c0_i32_0 = arith.constant 0 : i32
    %c0_i32_1 = arith.constant 0 : i32
    return %c0_i32, %c0_i32_0 : i32, i32
  }
  func.func @transform_3(%arg0: i32) -> (i32, i32) {
    %c0_i32 = arith.constant 0 : i32
    %c0_i32_0 = arith.constant 0 : i32
    return %arg0, %c0_i32 : i32, i32
  }
}

</mosaic_0001>

<bundles_post_ra>
// kernel: tpu_custom_call.1
= control target key start
LH: loop header
LB: loop body
LE: loop exit
PB: predicated region body
PF: predicated region fallthrough
CT: control target
= control target key end

     0   :  { %8 = vsyncpa [#allocation3], 0  ;;  %s644_s0 = inlined_call_operand.hbm [shape: f32[16,32], index: 0, kind: input, shape index: {}]   ;;  %s645_s1 = inlined_call_operand.vmem [shape: f32[1,32], index: 1, kind: input, shape index: {}]   ;;  %s646_s2 = inlined_call_operand.vmem [shape: f32[1,32], index: 2, kind: input, shape index: {}]   ;;  %s647_s3 = inlined_call_operand.hbm [shape: f32[16,32], index: 3, kind: output, shape index: {}]  }
   0x1   :  { %10 = vsyncpa [#allocation3 + $0x1], 0 }
   0x2   :  { %11 = vsyncpa [#allocation4], 0 }
   0x3   :  { %13 = vsyncpa [#allocation4 + $0x1], 0  ;;  %s490_s12 = smov 0   ;;  %s492_s13 = smov 0  }
   0x4   :  { %s494_s14 = smov 0   ;;  %s496_s15 = smov 0  }
   0x5 LB: > { %s511_s16 = sadd.s32 4294967295, %s466_s15   ;;  %s310_s17 = sadd.s32 4294967294, %s466_s15   ;;  %s466_s15 = sphi %s496_s15, %s664_s15   ;;  %s462_s14 = sphi %s494_s14, %s663_s14   ;;  %s458_s13 = sphi %s492_s13, %s662_s13   ;;  %s454_s12 = sphi %s490_s12, %s661_s12  }
   0x6   : > { %s515_s18 = sadd.s32 1, %s466_s15   ;;  %s26_s19 = sadd.s32 1, %s462_s14 }
   0x7   : > { %s23_s20 = ssub.s32 %s466_s15, %s515_s18  ;;  %p33_p0 = scmp.ne.s32.totalorder %s462_s14, %s458_s13 }
   0x8   : > { %p24_p1 = scmp.eq.s32.totalorder %s23_s20, 0  ;;  %p34_p2 = scmp.eq.s32.totalorder %s466_s15, 0 }
   0x9   : > { %p39_p3 = scmp.ne.s32.totalorder %s458_s13, %s454_s12  ;;  %p40_p4 = scmp.eq.s32.totalorder %s511_s16, 0 }
   0xa   : > { %s527_s21 = scalar_select %p24_p1, %s462_s14, %s26_s19  }
   0xb   : > { %p529_p5 = por %p34_p2, %p33_p0  ;;  %p533_p6 = por %p40_p4, %p39_p3 }
   0xc   : > { %p105_p7 = scmp.eq.s32.totalorder %s511_s16, 1  ;;  %p111_p8 = scmp.eq.s32.totalorder %s310_s17, 1 }
   0xd   : > { %s651_s23 = scalar_select %p533_p6, 1, 0 }
   0xe   : > { %p336_p10 = scmp.lt.s32.totalorder %s466_s15, 2  ;;  %p540_p11 = por %p105_p7, %p33_p0 }
   0xf   : > { %p544_p12 = por %p111_p8, %p39_p3  ;;  %s137_s26 = sand.u32 1, %s462_s14  }
  0x10   : > { %s652_s24 = scalar_select %p540_p11, 1, 0 }
  0x11   : > { %s653_s25 = scalar_select %p544_p12, 1, 0 }
  0x12   : > { %s314_s27 = sshll.u32 %s466_s15, 7  ;;  %s313_s28 = sshll.u32 %s137_s26, 3 }
  0x13   : > { %s553_s4 = scalar_lea.hbm %s644_s0, %s314_s27  ;;  %s141_s5 = scalar_lea.vmem [#allocation2], %s313_s28 }
  0x14   : > { %s148_s6 = sshll.u32 %s141_s5, 4  ;;  %p557_p13 = pnand %p336_p10, %p529_p5  ;;  %s561_s6 = int_to_ptr.vmem [resolvable:$true] %s148_s6 }
  0x15   : > { %s138_s8 = scalar_lea.sflag [#allocation3], %s137_s26  ;;  %s374_s9 = scalar_lea.hbm %s553_s4, 128 }
  0x16   : > { %p375_p2 = scmp.ne.s32.totalorder %s553_s4, %s374_s9  ;;  %p376_p3 = pneg %p557_p13 }
  0x17   : > { %s379_s17 = scalar_lea.hbm %s644_s0, 256  ;;  %p380_p5 = scmp.lt.s32.totalorder %s553_s4, %s644_s0 }
  0x18   : > { %p377_p4 = pnand %p376_p3, %p375_p2  ;;  %p381_p8 = scmp.lt.s32.totalorder %s379_s17, %s374_s9 }
  0x1a   : > { %p378_p7 = pneg %p377_p4  ;;  %p382_p10 = por %p381_p8, %p380_p5 }
  0x1c   : > { %p383_p9 = pnand %p382_p10, %p378_p7 }
  0x1e   : > { %386 = shalt.err (!%p383_p9)
}
  0x1f   : > { %s387_s22 = scalar_lea.vmem %s561_s6, 128  ;;  %s468_s26 = smov [#allocation2]  }
  0x20   : > { %p388_p0 = scmp.ne.s32.totalorder %s561_s6, %s387_s22  ;;  %s392_s27 = sshll.u32 %s468_s26, 4  ;;  %s393_s27 = int_to_ptr.vmem [resolvable:$false] %s392_s27 }
  0x21   : > { %s394_s28 = scalar_lea.vmem %s393_s27, 256  ;;  %p395_p4 = scmp.lt.s32.totalorder %s561_s6, %s393_s27 }
  0x22   : > { %p390_p1 = pnand %p388_p0, %p376_p3  ;;  %p396_p12 = scmp.lt.s32.totalorder %s394_s28, %s387_s22 }
  0x24   : > { %p391_p2 = pneg %p390_p1  ;;  %p397_p11 = por %p396_p12, %p395_p4 }
  0x26   : > { %p398_p6 = pnand %p397_p11, %p391_p2 }
  0x28   : > { %401 = shalt.err (!%p398_p6)
}
  0x29   : > { %331 = dma.hbm_to_vmem [thread:$0]  (!%p557_p13), %s553_s4, 128, %s561_s6, %s138_s8  }
  0x2a   : > { %p655_p9 = scmp.lt.s32.totalorder %s466_s15, 3  ;;  %p656_p7 = scmp.ge.s32.totalorder %s466_s15, 1 }
  0x2c   : > { %p154_p0 = pnand %p656_p7, %p655_p9 }
  0x2d   : > { %s588_s29 = sand.u32 (!%p154_p0), 1, %s458_s13   ;;  %p657_p6 = scmp.ne.s32.totalorder (!%p154_p0), %s651_s23, 0 }
  0x2e   : > { %157 = sbr.rel (%p154_p0) target bundleno = 392 (0x188), region = 32  ;;  %s316_s30 = sshll.u32 (!%p154_p0), %s588_s29, 3 }
  0x2f   : > { %s160_s5 = scalar_lea.sflag (!%p154_p0), [#allocation3], %s588_s29  ;;  %s163_s7 = scalar_lea.vmem (!%p154_p0), [#allocation2], %s316_s30 }
  0x33   : > { %445 = dma.done.wait (%p657_p6), %s160_s5, 128  }
  0x34   : > { %447 = vsyncadd (%p657_p6), %s160_s5, 4294967168  ;;  %vm187_vm0 = vcmask 261120   ;;  %v186_v0 = vld [vmem:[%s163_s7] sm:$0xff]  ;;  %s321_s9 = sshll.u32 %s511_s16, 7  ;;  %s185_s10 = scalar_lea.vmem [#allocation5], %s316_s30 }
  0x35   : > { %v188_v1 = vsel %vm187_vm0, %v186_v0, 0.0  ;;  %v318_v16 = vld [vmem:[%s645_s1] ss:$0 sm:$0xff]  ;;  %s240_s11 = sshll.u32 %s185_s10, 4  ;;  %s238_s20 = scalar_lea.hbm %s647_s3, %s321_s9  ;;  %s241_s11 = int_to_ptr.vmem [resolvable:$true] %s240_s11 }
  0x36   : > { %189 = vadd.xlane.f32.xlu0 %v188_v1  ;;  %v319_v18 = vld [vmem:[%s646_s2] ss:$0 sm:$0xff]  ;;  %s227_s22 = scalar_lea.sflag [#allocation4], %s588_s29  ;;  %s402_s26 = scalar_lea.vmem %s241_s11, 128 }
  0x37   : > { %p403_p11 = scmp.ne.s32.totalorder %s241_s11, %s402_s26  ;;  %p658_p12 = scmp.ne.s32.totalorder %s652_s24, 0 }
  0x38   : > { %s469_s27 = smov [#allocation5]  }
  0x39   : > { %p404_p13 = pnand %p403_p11, %p658_p12  ;;  %s406_s16 = sshll.u32 %s469_s27, 4  ;;  %s407_s16 = int_to_ptr.vmem [resolvable:$false] %s406_s16 }
  0x3a   : > { %s408_s28 = scalar_lea.vmem %s407_s16, 256  ;;  %p409_p3 = scmp.lt.s32.totalorder %s241_s11, %s407_s16 }
  0x3b   : > { %p405_p1 = pneg %p404_p13  ;;  %p410_p5 = scmp.lt.s32.totalorder %s408_s28, %s402_s26 }
  0x3d   : > { %p411_p8 = por %p410_p5, %p409_p3 }
  0x3f   : > { %p412_p10 = pnand %p411_p8, %p405_p1 }
  0xbf   : > { %v190_v2 = vpop.xlane.xlu0 %189 }
  0xc0   : > { %v191_v3 = vmul.f32 0.03125, %v190_v2 }
  0xc2   : > { %v192_v4 = vsub.f32 %v186_v0, %v191_v3 }
  0xc4   : > { %v193_v5 = vmul.f32 %v192_v4, %v192_v4 }
  0xc6   : > { %v194_v6 = vsel %vm187_vm0, %v193_v5, 0.0 }
  0xc7   : > { %195 = vadd.xlane.f32.xlu0 %v194_v6 }
 0x150   : > { %v196_v7 = vpop.xlane.xlu0 %195 }
 0x151   : > { %v197_v8 = vmul.f32 0.032258064, %v196_v7 }
 0x153   : > { %370 = vrsqrt.f32 %v197_v8  ;;  %vm200_vm1 = vcmp.eq.f32.partialorder %v197_v8, inf  ;;  %v203_v11 = vand.u32 2147483648, %v197_v8  ;;  %vm202_vm2 = vcmp.eq.f32.partialorder %v197_v8, 0.0 }
 0x160   : > { %v371_v9 = vpop.eup %370 }
 0x161   : > { %v199_v10 = vmul.f32 %v371_v9, %v197_v8 }
 0x163   : > { %v201_v12 = vsel %vm200_vm1, %v197_v8, %v199_v10 }
 0x164   : > { %v204_v13 = vsel %vm202_vm2, %v203_v11, %v201_v12 }
 0x165   : > { %v205_v14 = vadd.f32 1e-06, %v204_v13 }
 0x167   : > { %372 = vrcp.f32 %v205_v14 }
 0x174   : > { %v373_v15 = vpop.eup %372 }
 0x175   : > { %v209_v17 = vmul.f32 %v373_v15, %v192_v4 }
 0x177   : > { %v216_v19 = vmul.f32 %v318_v16, %v209_v17 }
 0x179   : > { %v224_v20 = vadd.f32 %v319_v18, %v216_v19 }
 0x17b   : > { %225 = vst.msk [vmem:[%s185_s10] sm:$0xff] %vm187_vm0, %v224_v20 }
 0x17c   : > { %415 = shalt.err (!%p412_p10)
}
 0x17d   : > { %s416_s30 = scalar_lea.hbm %s238_s20, 128  ;;  %s420_s7 = scalar_lea.hbm %s647_s3, 256 }
 0x17e   : > { %p417_p2 = scmp.ne.s32.totalorder %s238_s20, %s416_s30  ;;  %p421_p7 = scmp.lt.s32.totalorder %s238_s20, %s647_s3 }
 0x17f   : > { %p422_p0 = scmp.lt.s32.totalorder %s420_s7, %s416_s30 }
 0x180   : > { %p418_p4 = pnand %p417_p2, %p658_p12 }
 0x181   : > { %p423_p6 = por %p422_p0, %p421_p7 }
 0x182   : > { %p419_p9 = pneg %p418_p4 }
 0x184   : > { %p424_p11 = pnand %p423_p6, %p419_p9 }
 0x186   : > { %427 = shalt.err (!%p424_p11)
}
 0x187   : > { %326 = dma.vmem_to_hbm [thread:$0]  (%p658_p12), %s241_s11, 128, %s238_s20, %s227_s22  }
 0x188 PF: > { %s252_s6 = sand.u32 1, %s454_s12   ;;  %p659_p13 = scmp.ne.s32.totalorder %s653_s25, 0 }
 0x189   : > { %p660_p1 = scmp.ge.s32.totalorder %s466_s15, 2  ;;  %s253_s8 = scalar_lea.sflag [#allocation4], %s252_s6 }
 0x18b   : > { %p333_p3 = pnand %p660_p1, %p659_p13 }
 0x18d   : > { %p334_p5 = pneg %p333_p3 }
 0x18f   : > { %449 = dma.done.wait (%p334_p5), %s253_s8, 128  }
 0x190   : > { %451 = vsyncadd (%p334_p5), %s253_s8, 4294967168  ;;  %p16_p8 = scmp.ge.s32.totalorder %s515_s18, 4   ;;  %s661_s12 = smov %s458_s13 }
 0x191   : > { %s662_s13 = smov %s462_s14  ;;  %s663_s14 = smov %s527_s21 }
 0x192   : > { %s664_s15 = smov %s515_s18  ;;  %18 = sbr.rel (!%p16_p8) target bundleno = 5 (0x5), region = 77 }
 0x197   :  { %258 = vsyncpa [#allocation3], 1 }
 0x198   :  { %260 = vsyncpa [#allocation3 + $0x1], 1 }
 0x199   :  { %261 = vsyncpa [#allocation4], 1 }
 0x19a   :  { %263 = vsyncpa [#allocation4 + $0x1], 1 }

</bundles_post_ra>
